<compile_context>
chip_gen: v5e
topology: v5e:2x2
jax: 0.10.0
libtpu: 0.0.40
codegen_flags: <defaults>
</compile_context>

<pallas_src>
import functools
import math

import jax
import jax.numpy as jnp
from jax import lax
from jax.experimental import pallas as pl
from jax.experimental.pallas import tpu as pltpu


def _round_up(x, m):
    return ((x + m - 1) // m) * m


def _pick_tile(dim, candidates=(512, 256, 128)):
    for c in candidates:
        if dim % c == 0:
            return c
    return dim  # dim < 128: use the full dim (allowed as a block extent)


# ---------------------------------------------------------------------------
# Grouped projection: x (B, Sp, Ep) @ w (NG, Ep, Dg) -> (B, NG, Sp, Dg)
# Output is written directly in the attention layout (no XLA transpose after).
# ---------------------------------------------------------------------------

def _proj_kernel(x_ref, w_ref, o_ref, acc_ref):
    ke = pl.program_id(3)

    @pl.when(ke == 0)
    def _():
        acc_ref[...] = jnp.zeros_like(acc_ref)

    acc_ref[...] += jnp.dot(x_ref[0], w_ref[0], preferred_element_type=jnp.float32)

    @pl.when(ke == pl.num_programs(3) - 1)
    def _():
        o_ref[0, 0] = acc_ref[...].astype(o_ref.dtype)


def _proj_kernel_single(x_ref, w_ref, o_ref):
    # No K reduction -> skip the VMEM accumulator round trip entirely.
    o_ref[0, 0] = jnp.dot(
        x_ref[0], w_ref[0], preferred_element_type=jnp.float32
    ).astype(o_ref.dtype)


def grouped_projection(x, w, ts):
    B, Sp, Ep = x.shape
    NG, Ep2, Dg = w.shape
    assert Ep == Ep2
    tke = _pick_tile(Ep)
    n_ke = Ep // tke
    kernel = _proj_kernel if n_ke > 1 else _proj_kernel_single
    scratch = [pltpu.VMEM((ts, Dg), jnp.float32)] if n_ke > 1 else []
    return pl.pallas_call(
        kernel,
        out_shape=jax.ShapeDtypeStruct((B, NG, Sp, Dg), x.dtype),
        grid_spec=pltpu.PrefetchScalarGridSpec(
            num_scalar_prefetch=0,
            grid=(B, NG, Sp // ts, n_ke),
            in_specs=[
                pl.BlockSpec((1, ts, tke), lambda b, g, si, ke: (b, si, ke)),
                pl.BlockSpec((1, tke, Dg), lambda b, g, si, ke: (g, ke, 0)),
            ],
            out_specs=pl.BlockSpec((1, 1, ts, Dg),
                                   lambda b, g, si, ke: (b, g, si, 0)),
            scratch_shapes=scratch,
        ),
        compiler_params=pltpu.CompilerParams(
            dimension_semantics=("parallel", "parallel", "parallel", "arbitrary")),
    )(x, w)


# ---------------------------------------------------------------------------
# Flash attention (online softmax), G query heads per KV head processed per
# grid step (lane-dense blocks, GQA without repeating K/V in HBM).
# ---------------------------------------------------------------------------

def _flash_kernel(q_ref, k_ref, v_ref, o_ref, q_sc, m_sc, l_sc, acc_sc,
                  *, num_heads, d_k, d_v, kv_len, block_k, mask_kv):
    ki = pl.program_id(3)

    @pl.when(ki == 0)
    def _():
        # finite large-negative init: avoids exp(-inf - (-inf)) = NaN risk
        m_sc[...] = jnp.full_like(m_sc, -1e30)
        l_sc[...] = jnp.zeros_like(l_sc)
        acc_sc[...] = jnp.zeros_like(acc_sc)
        # hoist per-head q slices once per q tile (q block is resident across ki)
        for h in range(num_heads):
            q_sc[h] = q_ref[0, 0, :, h * d_k:(h + 1) * d_k]

    kmat = k_ref[0, 0]          # (tk, Dk)  bf16
    vmat = v_ref[0, 0]          # (tk, Dv)  bf16

    if mask_kv:
        kv_idx = ki * block_k + lax.broadcasted_iota(jnp.int32, (1, block_k), 1)
        valid = kv_idx < kv_len

    for h in range(num_heads):
        # QK^T without an explicit transpose (contract last axes). Scale is
        # already folded into the Q projection weights.
        s = lax.dot_general(q_sc[h], kmat, (((1,), (1,)), ((), ())),
                            preferred_element_type=jnp.float32)      # (tq, tk)
        if mask_kv:
            s = jnp.where(valid, s, jnp.float32(-1e30))
        m_prev = m_sc[h]
        m_new = jnp.maximum(m_prev, jnp.max(s, axis=-1, keepdims=True))
        alpha = jnp.exp(m_prev - m_new)
        p = jnp.exp(s - m_new)
        l_sc[h] = alpha * l_sc[h] + jnp.sum(p, axis=-1, keepdims=True)
        acc_sc[h] = alpha * acc_sc[h] + jnp.dot(
            p.astype(vmat.dtype), vmat, preferred_element_type=jnp.float32)
        m_sc[h] = m_new

    @pl.when(ki == pl.num_programs(3) - 1)
    def _():
        outs = []
        for h in range(num_heads):
            inv_l = pl.reciprocal(l_sc[h], approx=False)
            outs.append((acc_sc[h] * inv_l).astype(o_ref.dtype))
        o_ref[0, 0] = outs[0] if num_heads == 1 else jnp.concatenate(outs, axis=-1)


def flash_attention(q, k, v, *, ts, kv_len, heads_per_group, d_k, d_v):
    """q: (B, KVH, Sp, G*Dk), k: (B, KVH, Sp, Dk), v: (B, KVH, Sp, Dv)
       -> (B, KVH, Sp, G*Dv)."""
    B, KVH, Sp, GDk = q.shape
    assert GDk == heads_per_group * d_k
    nblk = Sp // ts
    mask_kv = Sp != kv_len
    kernel = functools.partial(
        _flash_kernel, num_heads=heads_per_group, d_k=d_k, d_v=d_v,
        kv_len=kv_len, block_k=ts, mask_kv=mask_kv)
    return pl.pallas_call(
        kernel,
        out_shape=jax.ShapeDtypeStruct((B, KVH, Sp, heads_per_group * d_v), q.dtype),
        grid_spec=pltpu.PrefetchScalarGridSpec(
            num_scalar_prefetch=0,
            grid=(B, KVH, nblk, nblk),
            in_specs=[
                pl.BlockSpec((1, 1, ts, heads_per_group * d_k),
                             lambda b, g, qi, ki: (b, g, qi, 0)),
                pl.BlockSpec((1, 1, ts, d_k), lambda b, g, qi, ki: (b, g, ki, 0)),
                pl.BlockSpec((1, 1, ts, d_v), lambda b, g, qi, ki: (b, g, ki, 0)),
            ],
            out_specs=pl.BlockSpec((1, 1, ts, heads_per_group * d_v),
                                   lambda b, g, qi, ki: (b, g, qi, 0)),
            scratch_shapes=[
                pltpu.VMEM((heads_per_group, ts, d_k), q.dtype),     # hoisted q
                pltpu.VMEM((heads_per_group, ts, 1), jnp.float32),   # running max
                pltpu.VMEM((heads_per_group, ts, 1), jnp.float32),   # running sum
                pltpu.VMEM((heads_per_group, ts, d_v), jnp.float32), # accumulator
            ],
        ),
        compiler_params=pltpu.CompilerParams(
            dimension_semantics=("parallel", "parallel", "parallel", "arbitrary")),
    )(q, k, v)


# ---------------------------------------------------------------------------
# Output dense: attn (B, KVH, Sp, G*Dv) x wd (KVH, G*Dv, Eo) -> (B, Sp, Eo)
# Contraction over the kv-group grid axis (arbitrary) + the in-block G*Dv dim,
# so it consumes the flash output layout directly (no head-merge transpose).
# ---------------------------------------------------------------------------

def _dense_kernel(a_ref, w_ref, o_ref, acc_ref):
    g = pl.program_id(3)

    @pl.when(g == 0)
    def _():
        acc_ref[...] = jnp.zeros_like(acc_ref)

    acc_ref[...] += jnp.dot(a_ref[0, 0], w_ref[0], preferred_element_type=jnp.float32)

    @pl.when(g == pl.num_programs(3) - 1)
    def _():
        o_ref[0] = acc_ref[...].astype(o_ref.dtype)


def _dense_kernel_single(a_ref, w_ref, o_ref):
    o_ref[0] = jnp.dot(a_ref[0, 0], w_ref[0],
                       preferred_element_type=jnp.float32).astype(o_ref.dtype)


def grouped_dense(attn, w, ts, out_dtype=jnp.float32):
    B, KVH, Sp, GDv = attn.shape
    KVH2, GDv2, Eo = w.shape
    assert KVH == KVH2 and GDv == GDv2
    tn = _pick_tile(Eo)
    kernel = _dense_kernel if KVH > 1 else _dense_kernel_single
    scratch = [pltpu.VMEM((ts, tn), jnp.float32)] if KVH > 1 else []
    return pl.pallas_call(
        kernel,
        out_shape=jax.ShapeDtypeStruct((B, Sp, Eo), out_dtype),
        grid_spec=pltpu.PrefetchScalarGridSpec(
            num_scalar_prefetch=0,
            grid=(B, Sp // ts, Eo // tn, KVH),
            in_specs=[
                pl.BlockSpec((1, 1, ts, GDv), lambda b, si, j, g: (b, g, si, 0)),
                pl.BlockSpec((1, GDv, tn), lambda b, si, j, g: (g, 0, j)),
            ],
            out_specs=pl.BlockSpec((1, ts, tn), lambda b, si, j, g: (b, si, j)),
            scratch_shapes=scratch,
        ),
        compiler_params=pltpu.CompilerParams(
            dimension_semantics=("parallel", "parallel", "parallel", "arbitrary")),
    )(attn, w)


# ---------------------------------------------------------------------------
# MultiHeadAttention forward (fused QKV, no bias, no cache, no mask)
# ---------------------------------------------------------------------------

class MultiHeadAttentionPallas:
    def __init__(self, emb_dim, emb_kq, emb_v, nheads, kvheads, key,
                 compute_dtype=jnp.bfloat16):
        assert nheads % kvheads == 0
        self.emb_dim = emb_dim
        self.emb_kq_per_head = emb_kq
        self.emb_v_per_head = emb_v
        self.nheads = nheads
        self.kvheads = kvheads
        self.expansion = nheads // kvheads
        self.compute_dtype = compute_dtype

        std = 0.02
        k1, k2 = jax.random.split(key)
        self.splits = [nheads * emb_kq, kvheads * emb_kq, kvheads * emb_v]
        # PyTorch nn.Linear weight layout (out_features, in_features),
        # reset_parameters() -> trunc_normal(std=0.02), use_bias=False.
        self.w_qkv = std * jax.random.truncated_normal(
            k1, -2.0, 2.0, (sum(self.splits), emb_dim), dtype=jnp.float32)
        self.w_dense = std * jax.random.truncated_normal(
            k2, -2.0, 2.0, (emb_dim, nheads * emb_v), dtype=jnp.float32)

        # --- kernel-friendly weight layouts, built once at init (free) ---
        Ep = emb_dim if emb_dim < 128 else _round_up(emb_dim, 128)
        self.e_pad = Ep
        G = self.expansion
        scale = 1.0 / math.sqrt(emb_kq)   # folded into the Q weights
        s0, s1, _ = self.splits
        wq_rows = self.w_qkv[:s0]
        wk_rows = self.w_qkv[s0:s0 + s1]
        wv_rows = self.w_qkv[s0 + s1:]

        def prep(w_rows, ngroups, dg, fold_scale=1.0):
            wt = (w_rows * fold_scale).T                       # (E, ngroups*dg)
            wt = wt.reshape(emb_dim, ngroups, dg).transpose(1, 0, 2)
            if Ep != emb_dim:
                wt = jnp.pad(wt, ((0, 0), (0, Ep - emb_dim), (0, 0)))
            return wt.astype(compute_dtype)

        self.wq = prep(wq_rows, kvheads, G * emb_kq, fold_scale=scale)
        self.wk = prep(wk_rows, kvheads, emb_kq)
        self.wv = prep(wv_rows, kvheads, emb_v)

        wd = self.w_dense.T.reshape(kvheads, G * emb_v, emb_dim)
        if Ep != emb_dim:
            wd = jnp.pad(wd, ((0, 0), (0, 0), (0, Ep - emb_dim)))
        self.wd = wd.astype(compute_dtype)

    def __call__(self, x):
        B, S, E = x.shape
        assert E == self.emb_dim
        ts = min(256, _round_up(S, 8))           # shared seq tile (q and kv)
        Sp = _round_up(S, ts)
        Ep = self.e_pad
        xp = x
        if Sp != S or Ep != E:
            xp = jnp.pad(x, ((0, 0), (0, Sp - S), (0, Ep - E)))
        xp = xp.astype(self.compute_dtype)

        # projections directly in attention layout (B, KVH, Sp, ·)
        q = grouped_projection(xp, self.wq, ts)      # (B, KVH, Sp, G*Dk), scaled
        k = grouped_projection(xp, self.wk, ts)      # (B, KVH, Sp, Dk)
        v = grouped_projection(xp, self.wv, ts)      # (B, KVH, Sp, Dv)

        attn = flash_attention(q, k, v, ts=ts, kv_len=S,
                               heads_per_group=self.expansion,
                               d_k=self.emb_kq_per_head,
                               d_v=self.emb_v_per_head)  # (B, KVH, Sp, G*Dv)

        out = grouped_dense(attn, self.wd, ts, out_dtype=jnp.float32)
        if Sp != S or Ep != E:
            out = out[:, :S, :E]
        return out


# ---------------------------------------------------------------------------
# References: (a) bf16-matched (same casts / layouts as the kernels, tight tol),
#             (b) original fp32 PyTorch-semantics math (loose tol).
# ---------------------------------------------------------------------------

def _reference_matched(mha, x):
    B, S, E = x.shape
    KVH = mha.kvheads
    Dk, Dv = mha.emb_kq_per_head, mha.emb_v_per_head
    G = mha.expansion
    f32 = jnp.float32
    hi = lax.Precision.HIGHEST
    cd = mha.compute_dtype

    xb = x.astype(cd).astype(f32)
    wq = mha.wq[:, :E, :].astype(f32)          # scale already folded
    wk = mha.wk[:, :E, :].astype(f32)
    wv = mha.wv[:, :E, :].astype(f32)
    wd = mha.wd[:, :, :E].astype(f32)

    q = jnp.einsum('bse,gek->bgsk', xb, wq, precision=hi).astype(cd).astype(f32)
    k = jnp.einsum('bse,gek->bgsk', xb, wk, precision=hi).astype(cd).astype(f32)
    v = jnp.einsum('bse,gek->bgsk', xb, wv, precision=hi).astype(cd).astype(f32)

    q = q.reshape(B, KVH, S, G, Dk)
    s = jnp.einsum('bgsnd,bgtd->bgnst', q, k, precision=hi)
    m = s.max(axis=-1, keepdims=True)
    p = jnp.exp(s - m)
    l = p.sum(axis=-1, keepdims=True)
    pv = jnp.einsum('bgnst,bgtd->bgnsd', p.astype(cd).astype(f32), v, precision=hi)
    attn = (pv / l).astype(cd).astype(f32)                     # (B,KVH,G,S,Dv)
    attn = attn.transpose(0, 1, 3, 2, 4).reshape(B, KVH, S, G * Dv)
    return jnp.einsum('bgsk,gke->bse', attn, wd, precision=hi)


def _reference_fp32(mha, x):
    B, S, E = x.shape
    H, KVH = mha.nheads, mha.kvheads
    Dk, Dv = mha.emb_kq_per_head, mha.emb_v_per_head
    G = mha.expansion
    hi = lax.Precision.HIGHEST

    qkv = jnp.einsum('me,ne->mn', x.reshape(B * S, E), mha.w_qkv, precision=hi)
    s0, s1, _ = mha.splits
    q = qkv[:, :s0].reshape(B, S, H, Dk).transpose(0, 2, 1, 3)
    k = qkv[:, s0:s0 + s1].reshape(B, S, KVH, Dk).transpose(0, 2, 1, 3)
    v = qkv[:, s0 + s1:].reshape(B, S, KVH, Dv).transpose(0, 2, 1, 3)
    k = jnp.repeat(k, G, axis=1)
    v = jnp.repeat(v, G, axis=1)
    s = jnp.einsum('bhqd,bhkd->bhqk', q, k, precision=hi) / math.sqrt(Dk)
    p = jax.nn.softmax(s, axis=-1)
    a = jnp.einsum('bhqk,bhkd->bhqd', p, v, precision=hi)
    a = a.transpose(0, 2, 1, 3).reshape(B * S, H * Dv)
    out = jnp.einsum('mk,ek->me', a, mha.w_dense, precision=hi)
    return out.reshape(B, S, E)


if __name__ == "__main__":
    key = jax.random.PRNGKey(0)
    k_param, k_x = jax.random.split(key)

    # small, module-consistent shapes
    batch, seq = 2, 8
    emb_dim, nheads, kvheads = 32, 4, 2
    emb_kq = emb_v = 8

    mha = MultiHeadAttentionPallas(emb_dim, emb_kq, emb_v, nheads, kvheads, k_param)
    x = jax.random.normal(k_x, (batch, seq, emb_dim), dtype=jnp.float32)

    out = jax.block_until_ready(mha(x))
    assert out.shape == (batch, seq, emb_dim)

    ref_matched = _reference_matched(mha, x)
    ref_fp32 = _reference_fp32(mha, x)
    assert jnp.allclose(out, ref_matched, atol=2e-3, rtol=2e-3), \
        "mismatch vs bf16-matched reference"
    assert jnp.allclose(out, ref_fp32, atol=5e-3, rtol=5e-3), \
        "mismatch vs fp32 reference"

    print("KERNEL_OK")
</pallas_src>

<mosaic_0001>
module attributes {stable_mosaic.version = 11 : i64} {
  func.func @_proj_kernel_single(%arg0: i32, %arg1: i32, %arg2: i32, %arg3: i32, %arg4: memref<1x8x32xbf16, #tpu.memory_space<vmem>>, %arg5: memref<1x32x16xbf16, #tpu.memory_space<vmem>>, %arg6: memref<1x1x8x16xbf16, #tpu.memory_space<vmem>>) attributes {dimension_semantics = [#tpu.dimension_semantics<parallel>, #tpu.dimension_semantics<parallel>, #tpu.dimension_semantics<parallel>, #tpu.dimension_semantics<arbitrary>], iteration_bounds = array<i64: 2, 2, 1, 1>, scalar_prefetch = 0 : i64, scratch_operands = 0 : i64, tpu.core_type = #tpu.core_type<tc>, window_params = [{transform_indices = @transform_0, window_bounds = array<i64: 1, 8, 32>}, {transform_indices = @transform_1, window_bounds = array<i64: 1, 32, 16>}, {transform_indices = @transform_2, window_bounds = array<i64: 1, 1, 8, 16>}]} {
    %c0 = arith.constant 0 : index
    %c0_0 = arith.constant 0 : index
    %c0_1 = arith.constant 0 : index
    %0 = vector.load %arg4[%c0, %c0_0, %c0_1] : memref<1x8x32xbf16, #tpu.memory_space<vmem>>, vector<1x8x32xbf16>
    %1 = vector.shape_cast %0 : vector<1x8x32xbf16> to vector<8x32xbf16>
    %c0_2 = arith.constant 0 : index
    %c0_3 = arith.constant 0 : index
    %c0_4 = arith.constant 0 : index
    %2 = vector.load %arg5[%c0_2, %c0_3, %c0_4] : memref<1x32x16xbf16, #tpu.memory_space<vmem>>, vector<1x32x16xbf16>
    %3 = vector.shape_cast %2 : vector<1x32x16xbf16> to vector<32x16xbf16>
    %cst = arith.constant dense<0.000000e+00> : vector<8x16xf32>
    %4 = tpu.matmul %1, %3, %cst {dimension_numbers = #tpu.dot_dimension_numbers<[1], [0], [0], [1], [0, 0, 1, 1], [], []>} : vector<8x32xbf16>, vector<32x16xbf16>, vector<8x16xf32> -> vector<8x16xf32>
    %5 = arith.truncf %4 : vector<8x16xf32> to vector<8x16xbf16>
    %c0_5 = arith.constant 0 : index
    %c0_6 = arith.constant 0 : index
    %c0_7 = arith.constant 0 : index
    %c0_8 = arith.constant 0 : index
    %6 = vector.load %arg6[%c0_5, %c0_6, %c0_7, %c0_8] : memref<1x1x8x16xbf16, #tpu.memory_space<vmem>>, vector<1x1x8x16xbf16>
    %7 = vector.shape_cast %6 : vector<1x1x8x16xbf16> to vector<8x16xbf16>
    %8 = vector.shape_cast %5 : vector<8x16xbf16> to vector<1x1x8x16xbf16>
    tpu.vector_store %arg6[%c0_5, %c0_6, %c0_7, %c0_8], %8 {strides = array<i32>} : memref<1x1x8x16xbf16, #tpu.memory_space<vmem>>, vector<1x1x8x16xbf16>,
    return
  }
  func.func @transform_0(%arg0: i32, %arg1: i32, %arg2: i32, %arg3: i32) -> (i32, i32, i32) {
    %c0_i32 = arith.constant 0 : i32
    return %arg0, %arg2, %arg3 : i32, i32, i32
  }
  func.func @transform_1(%arg0: i32, %arg1: i32, %arg2: i32, %arg3: i32) -> (i32, i32, i32) {
    %c0_i32 = arith.constant 0 : i32
    %c0_i32_0 = arith.constant 0 : i32
    return %arg1, %arg3, %c0_i32 : i32, i32, i32
  }
  func.func @transform_2(%arg0: i32, %arg1: i32, %arg2: i32, %arg3: i32) -> (i32, i32, i32, i32) {
    %c0_i32 = arith.constant 0 : i32
    %c0_i32_0 = arith.constant 0 : i32
    return %arg0, %arg1, %arg2, %c0_i32 : i32, i32, i32, i32
  }
}

</mosaic_0001>

<bundles_post_ra>
// kernel: tpu_custom_call.1
= control target key start
LH: loop header
LB: loop body
LE: loop exit
PB: predicated region body
PF: predicated region fallthrough
CT: control target
= control target key end

     0   :  { %7 = vsyncpa [#allocation3], 0  ;;  %s720_s0 = inlined_call_operand.vmem [shape: bf16[2,8,32], index: 0, kind: input, shape index: {}]   ;;  %s721_s1 = inlined_call_operand.vmem [shape: bf16[2,32,16], index: 1, kind: input, shape index: {}]   ;;  %s722_s2 = inlined_call_operand.hbm [shape: bf16[2,2,8,16], index: 2, kind: output, shape index: {}]  }
   0x1   :  { %9 = vsyncpa [#allocation3 + $0x1], 0  ;;  %s595_s9 = smov 0   ;;  %s597_s10 = smov 0  }
   0x2   :  { %s599_s11 = smov 0   ;;  %s601_s12 = smov 0  }
   0x3   :  { %s603_s13 = smov 0   ;;  %s605_s14 = smov 0  }
   0x4   :  { %s607_s15 = smov 0   ;;  %s609_s16 = smov 0  }
   0x5 LB: > { %s387_s17 = sadd.s32 4294967295, %s578_s16   ;;  %s388_s18 = sadd.s32 4294967294, %s578_s16   ;;  %s578_s16 = sphi %s609_s16, %s15_s16   ;;  %s574_s15 = sphi %s607_s15, %s731_s15   ;;  %s570_s14 = sphi %s605_s14, %s730_s14   ;;  %s566_s13 = sphi %s603_s13, %s729_s13   ;;  %s562_s12 = sphi %s601_s12, %s728_s12   ;;  %s558_s11 = sphi %s599_s11, %s727_s11   ;;  %s554_s10 = sphi %s597_s10, %s726_s10   ;;  %s550_s9 = sphi %s595_s9, %s725_s9  }
   0x6   : > { %s37_s19 = sadd.s32 1, %s570_s14  ;;  %s41_s20 = sadd.s32 1, %s574_s15 }
   0x7   : > { %p39_p0 = scmp.ge.s32.totalorder %s37_s19, 2  ;;  %p120_p1 = scmp.ne.s32.totalorder %s558_s11, %s554_s10 }
   0x8   : > { %p121_p2 = scmp.eq.s32.totalorder %s387_s17, 3  ;;  %p126_p5 = scmp.ne.s32.totalorder %s554_s10, %s550_s9 }
   0x9   : > { %s733_s19 = smov (%p39_p0, %s37_s19), 0  ;;  %s735_s20 = smov (!%p39_p0, %s41_s20), %s574_s15 }
   0xa   : > { %s104_s21 = ssub.s32 %s570_s14, %s733_s19  ;;  %p646_p3 = por %p121_p2, %p120_p1 }
   0xb   : > { %p43_p4 = scmp.ge.s32.totalorder %s735_s20, 2  ;;  %p127_p6 = scmp.eq.s32.totalorder %s388_s18, 3 }
   0xc   : > { %p391_p7 = scmp.ge.s32.totalorder %s578_s16, 1  ;;  %p171_p9 = scmp.lt.s32.totalorder %s578_s16, 5 }
   0xd   : > { %s737_s20 = smov (%p43_p4, %s735_s20), 0  ;;  %p655_p8 = por %p127_p6, %p126_p5 }
   0xe   : > { %s103_s24 = ssub.s32 %s574_s15, %s737_s20  ;;  %s110_s25 = sadd.s32 1, %s558_s11 }
   0xf   : > { %s105_s26 = sor.u32 %s104_s21, %s103_s24  ;;  %p172_p10 = pnand %p391_p7, %p171_p9 }
  0x10   : > { %p108_p11 = scmp.eq.s32.totalorder %s105_s26, 0  ;;  %p218_p12 = scmp.lt.s32.totalorder (!%p172_p10), %s562_s12, 1 }
  0x11   : > { %175 = sbr.rel (%p172_p10) target bundleno = 168 (0xa8), region = 28  ;;  %p207_p13 = scmp.lt.s32.totalorder (!%p172_p10), %s566_s13, 1 }
  0x12   : > { %s664_s27 = scalar_select %p108_p11, %s558_s11, %s110_s25  }
  0x13   : > { %s406_s18 = sshll.u32 (!%p172_p10), %s566_s13, 1  ;;  %s204_s24 = sand.u32 (!%p172_p10), 1, %s554_s10  }
  0x14   : > { %s277_s21 = sadd.s32 (!%p172_p10), %s562_s12, %s406_s18  ;;  %s392_s26 = sshll.u32 (!%p172_p10), %s204_s24, 2 }
  0x15   : > { %s407_s25 = sshll.u32 (!%p172_p10), %s277_s21, 2 }
  0x16   : > { %s219_s28 = scalar_select %p218_p12, %s562_s12, 1  ;;  %vm245_vm0 = vcmask 261120   ;;  %vm263_vm1 = vcmask 125952  }
  0x17   : > { %s208_s29 = scalar_select %p207_p13, %s566_s13, 1 }
  0x18   : > { %s410_s30 = sshll.u32 %s219_s28, 4 }
  0x19   : > { %s225_s5 = scalar_lea.vmem %s721_s1, %s410_s30  ;;  %s393_s6 = sshll.u32 %s208_s29, 2 }
  0x1a   : > { %v412_v0 = vld [vmem:[%s225_s5 + $0x8] sm:$0xff]  ;;  %v411_v1 = vld [vmem:[%s225_s5] sm:$0xff]  ;;  %s216_s17 = scalar_lea.vmem %s720_s0, %s393_s6  ;;  %s279_s29 = scalar_lea.hbm %s722_s2, %s407_s25 }
  0x1b   : > { %255 = vmatpush.bf16.msra.mxu0 %v412_v0  ;;  %v228_v2 = vld [vmem:[%s216_s17] sm:$0xf]  ;;  %s206_s30 = scalar_lea.vmem [#allocation2], %s392_s26  ;;  %s283_s5 = sshll.u32 %s279_s29, 4  ;;  %s284_s5 = int_to_ptr.hbm [resolvable:$true] %s283_s5 }
  0x1c   : > { %s281_s4 = sshll.u32 %s206_s30, 4  ;;  %s266_s6 = scalar_lea.sflag [#allocation3], %s204_s24  ;;  %s282_s4 = int_to_ptr.vmem [resolvable:$true] %s281_s4 }
  0x1d   : > { %s498_s13 = sshra.s32 %s284_s5, 4  ;;  %s504_s17 = scalar_lea.hbm %s722_s2, 16  ;;  %s499_s13 = int_to_ptr.hbm [resolvable:$true] %s498_s13 }
  0x1e   : > { %s500_s12 = scalar_lea.hbm %s499_s13, 4  ;;  %p505_p4 = scmp.lt.s32.totalorder %s499_s13, %s722_s2 }
  0x1f   : > { %256 = vmatpush.bf16.msra.mxu0 %v411_v1  ;;  %p501_p0 = scmp.ne.s32.totalorder %s499_s13, %s500_s12  ;;  %p506_p5 = scmp.lt.s32.totalorder %s504_s17, %s500_s12 }
  0x21   : > { %p502_p1 = pnand %p501_p0, %p646_p3  ;;  %p507_p6 = por %p506_p5, %p505_p4 }
  0x22   : > { %404 = vmatmul.msk.bf16.vlgmr.msra.gmra.mxu0 %vm245_vm0, %v228_v2 }
  0x23   : > { %p503_p2 = pneg %p502_p1 }
  0x25   : > { %p508_p7 = pnand %p507_p6, %p503_p2 }
  0x9f   : > { %v258_v3 = vpop.f32.mrf.mxu0 }
  0xa0   : > { %v262_v4 = vpack.c.bf16 %v258_v3, %v258_v3 }
  0xa2   : > { %264 = vst.msk [vmem:[%s206_s30] sm:$0xf] %vm263_vm1, %v262_v4 }
  0xa3   : > { %511 = shalt.err (!%p508_p7)
}
  0xa4   : > { %413 = dma.vmem_to_hbm [thread:$0]  (%p646_p3), %s282_s4, 64, %s284_s5, %s266_s6  }
  0xa7   : > { %v260_v5 = vpop.f32.mrf.mxu0 }
  0xa8 PF: > { %p419_p9 = scmp.ge.s32.totalorder %s578_s16, 2  ;;  %s295_s24 = sand.u32 1, %s550_s9  }
  0xa9   : > { %s296_s25 = scalar_lea.sflag [#allocation3], %s295_s24 }
  0xaa   : > { %p416_p10 = pnand %p419_p9, %p655_p8 }
  0xac   : > { %p417_p11 = pneg %p416_p10 }
  0xae   : > { %545 = dma.done.wait (%p417_p11), %s296_s25, 64  }
  0xaf   : > { %547 = vsyncadd (%p417_p11), %s296_s25, 4294967232  ;;  %s15_s16 = sadd.s32 1, %s578_s16   ;;  %s725_s9 = smov %s554_s10 }
  0xb0   : > { %p12_p12 = scmp.ge.s32.totalorder %s15_s16, 6   ;;  %s726_s10 = smov %s558_s11 }
  0xb1   : > { %s727_s11 = smov %s664_s27  ;;  %s728_s12 = smov %s570_s14 }
  0xb2   : > { %s729_s13 = smov %s574_s15  ;;  %s730_s14 = smov %s733_s19 }
  0xb3   : > { %s731_s15 = smov %s737_s20  ;;  %14 = sbr.rel (!%p12_p12) target bundleno = 5 (0x5), region = 66 }
  0xb8   :  { %302 = vsyncpa [#allocation3], 1 }
  0xb9   :  { %304 = vsyncpa [#allocation3 + $0x1], 1 }

</bundles_post_ra>
